<compile_context>
chip_gen: v6e
topology: v6e:2x2x1
jax: 0.10.0
libtpu: 0.0.40
codegen_flags: <defaults>
</compile_context>

<pallas_src>
import jax
import jax.numpy as jnp
from jax.experimental import pallas as pl
from jax.experimental.pallas import tpu as pltpu

EPS = 1e-5


def prenorm_kernel(x_ref, w_ref, wb_ref, o_ref):
    # x_ref: (1, C, TL)   w_ref: (C, C) [f32 or bf16]   wb_ref: (C, 1) f32
    # o_ref: (1, C, TL)
    x = x_ref[0].astype(jnp.float32)                              # (C, TL), f32 stats
    mean = jnp.mean(x, axis=0, keepdims=True)                     # (1, TL)
    var = jnp.mean((x - mean) ** 2, axis=0, keepdims=True)        # (1, TL)
    xn = (x - mean) * jax.lax.rsqrt(var + EPS)                    # (C, TL); g/b folded into W'

    # fn: pointwise Conv1d (kernel_size=1) == channel-mixing matmul + bias.
    # Weight already in its matmul dtype (cast once in the wrapper).
    y = jnp.dot(w_ref[...], xn.astype(w_ref.dtype),
                preferred_element_type=jnp.float32) + wb_ref[...]
    o_ref[0] = y.astype(o_ref.dtype)


def _pick_tl(C, L, x_bytes, out_bytes, w_bytes, budget_bytes=40 << 20):
    """Pick a lane-dense L tile (multiple of 128).

    Budget accounts for: single-buffered resident weight + bias, double-buffered
    x/out tiles, and the f32 intermediates (x upcast, xn, y) — sized so the whole
    kernel fits comfortably under v7x's 64 MiB VMEM with margin.
    """
    weight_resident = C * C * w_bytes + C * 4 + (2 << 20)         # weight + bias + scratch margin
    tile_budget = max(budget_bytes - weight_resident, 2 << 20)
    per_l = C * (2 * x_bytes + 2 * out_bytes + 3 * 4)             # dbuf x/out + 3 f32 temps
    tl_max = max(128, tile_budget // per_l)
    cands = [c for c in (8192, 4096, 2048, 1024, 512, 256, 128) if c <= tl_max]
    if not cands:
        cands = [128]
    # Minimize padded length, then prefer the largest tile (fewer grid steps).
    return min(cands, key=lambda c: (pl.cdiv(L, c) * c, -c))


def prenorm(x, g, b, w, wb, *, tl=None, use_bf16_matmul=None):
    """y = Conv1d_1x1(LayerNorm_over_C(x)); x is (B, C, L) NCL layout."""
    B, C, L = x.shape
    x_bytes = jnp.dtype(x.dtype).itemsize

    # bf16 MXU operands pay off once the kernel becomes MXU-bound (C >~ 512),
    # or trivially when x is already bf16. f32 accumulator either way.
    if use_bf16_matmul is None:
        use_bf16_matmul = (C >= 512) or (x.dtype == jnp.bfloat16)
    matmul_dtype = jnp.bfloat16 if use_bf16_matmul else jnp.float32
    w_bytes = jnp.dtype(matmul_dtype).itemsize

    # ---- one-time param fold: LayerNorm affine into the pointwise conv ----
    #   W'[o, c] = W[o, c] * g[c]          wb'[o] = sum_c W[o, c] * b[c] + wb[o]
    g_c = g.reshape(C).astype(jnp.float32)
    b_c = b.reshape(C, 1).astype(jnp.float32)
    w32 = w.astype(jnp.float32)
    w_f = (w32 * g_c[None, :]).astype(matmul_dtype)               # (C, C), cast ONCE here
    wb_f = w32 @ b_c + wb.astype(jnp.float32)                     # (C, 1), stays f32

    if tl is None:
        tl = _pick_tl(C, L, x_bytes, x_bytes, w_bytes)
    # Pad L to a multiple of the tile so stores stay lane-dense / unmasked;
    # padded columns are sliced off after the call.
    Lp = pl.cdiv(L, tl) * tl
    xp = x if Lp == L else jnp.pad(x, ((0, 0), (0, 0), (0, Lp - L)))
    grid = (B, Lp // tl)

    # Explicit scoped-VMEM limit derived from actual usage (weight single-buffered,
    # x/out double-buffered, 3 f32 (C,TL) temps), capped at v7x's 64 MiB physical.
    vmem_need = (C * C * w_bytes + C * 4
                 + 2 * C * tl * x_bytes          # x tiles
                 + 2 * C * tl * x_bytes          # out tiles
                 + 3 * C * tl * 4)               # f32 intermediates
    vmem_limit = min(int(vmem_need * 1.3) + (2 << 20), 64 << 20)

    cost = pl.CostEstimate(
        flops=2 * B * C * C * Lp + 7 * B * C * Lp,
        transcendentals=B * Lp,
        bytes_accessed=2 * B * C * Lp * x_bytes + C * C * w_bytes + C * 4,
    )

    # TODO(synk): for very large C (weight > ~32 MiB, e.g. C >= 2896 bf16 on v7x)
    # add a third "arbitrary" grid axis over output channels with an xn VMEM
    # scratch computed once under @pl.when(co == 0).
    out = pl.pallas_call(
        prenorm_kernel,
        out_shape=jax.ShapeDtypeStruct((B, C, Lp), x.dtype),
        grid=grid,
        in_specs=[
            pl.BlockSpec((1, C, tl), lambda i, j: (i, 0, j)),               # x tile
            pl.BlockSpec((C, C), lambda i, j: (0, 0),
                         pipeline_mode=pl.Buffered(1)),                     # folded W (resident)
            pl.BlockSpec((C, 1), lambda i, j: (0, 0),
                         pipeline_mode=pl.Buffered(1)),                     # folded bias (resident)
        ],
        out_specs=pl.BlockSpec((1, C, tl), lambda i, j: (i, 0, j)),
        compiler_params=pltpu.CompilerParams(
            dimension_semantics=("parallel", "parallel"),
            vmem_limit_bytes=vmem_limit),
        cost_estimate=cost,
    )(xp, w_f, wb_f)

    return out if Lp == L else out[:, :, :L]


def prenorm_ref(x, g, b, w, wb):
    # Pure-JAX reference matching the torch module exactly.
    x32 = x.astype(jnp.float32)
    mean = jnp.mean(x32, axis=1, keepdims=True)
    var = jnp.mean((x32 - mean) ** 2, axis=1, keepdims=True)
    xn = (x32 - mean) / jnp.sqrt(var + EPS) * g + b
    y = jnp.einsum("oc,bcl->bol", w, xn) + wb[None, :, :]
    return y.astype(x.dtype)


def _run_case(key, B, C, L, tl=None):
    kx, kw, kwb, kg, kb = jax.random.split(key, 5)
    x = jax.random.normal(kx, (B, C, L), dtype=jnp.float32)
    # LayerNorm params shaped exactly as in __init__ (g:(1,dim,1), b:(1,dim,1));
    # perturbed from ones/zeros so the g/b weight-folding path is actually tested.
    g = jnp.ones((1, C, 1), jnp.float32) + 0.1 * jax.random.normal(kg, (1, C, 1), jnp.float32)
    b = 0.1 * jax.random.normal(kb, (1, C, 1), jnp.float32)
    # fn params (pointwise Conv1d dim->dim).
    w = jax.random.normal(kw, (C, C), dtype=jnp.float32) * 0.1
    wb = jax.random.normal(kwb, (C, 1), dtype=jnp.float32) * 0.1

    out = prenorm(x, g, b, w, wb, tl=tl)
    out = jax.block_until_ready(out)
    ref = prenorm_ref(x, g, b, w, wb)
    assert out.shape == (B, C, L)
    assert jnp.allclose(out, ref, atol=1e-4, rtol=1e-4), f"mismatch (B={B},C={C},L={L})"


if __name__ == "__main__":
    key = jax.random.PRNGKey(0)
    k1, k2 = jax.random.split(key)

    # Case 1: tiny channel count (matches module-spec toy size); auto tile picks
    # a lane-dense L tile, grid (B, L // TL).
    _run_case(k1, B=2, C=4, L=256)

    # Case 2: realistic channel count + L NOT a multiple of 128 — exercises the
    # sublane-tiled (8,128) layout, the resident single-buffered weight, and the
    # padding/slice path for the last tile.
    _run_case(k2, B=2, C=128, L=300)

    print("KERNEL_OK")
</pallas_src>

<mosaic_0001>
module attributes {stable_mosaic.version = 11 : i64} {
  func.func @prenorm_kernel(%arg0: i32, %arg1: i32, %arg2: memref<1x4x256xf32, #tpu.memory_space<vmem>>, %arg3: memref<4x4xf32, #tpu.memory_space<vmem>>, %arg4: memref<4x1xf32, #tpu.memory_space<vmem>>, %arg5: memref<1x4x256xf32, #tpu.memory_space<vmem>>) attributes {dimension_semantics = [#tpu.dimension_semantics<parallel>, #tpu.dimension_semantics<parallel>], iteration_bounds = array<i64: 2, 1>, scalar_prefetch = 0 : i64, scratch_operands = 0 : i64, tpu.core_type = #tpu.core_type<tc>, window_params = [{transform_indices = @transform_0, window_bounds = array<i64: 1, 4, 256>}, {pipeline_mode = #tpu.pipeline_mode<synchronous>, transform_indices = @transform_1, window_bounds = array<i64: 4, 4>}, {pipeline_mode = #tpu.pipeline_mode<synchronous>, transform_indices = @transform_2, window_bounds = array<i64: 4, 1>}, {transform_indices = @transform_3, window_bounds = array<i64: 1, 4, 256>}]} {
    %c0 = arith.constant 0 : index
    %c0_0 = arith.constant 0 : index
    %c0_1 = arith.constant 0 : index
    %0 = vector.load %arg2[%c0, %c0_0, %c0_1] : memref<1x4x256xf32, #tpu.memory_space<vmem>>, vector<1x4x256xf32>
    %1 = vector.shape_cast %0 : vector<1x4x256xf32> to vector<4x256xf32>
    %cst = arith.constant dense<0.000000e+00> : vector<256xf32>
    %2 = vector.multi_reduction <add>, %1, %cst [0] : vector<4x256xf32> to vector<256xf32>
    %3 = vector.shape_cast %2 : vector<256xf32> to vector<1x256xf32>
    %cst_2 = arith.constant 4.000000e+00 : f32
    %4 = vector.broadcast %cst_2 : f32 to vector<1x256xf32>
    %5 = arith.divf %3, %4 : vector<1x256xf32>
    %6 = vector.broadcast %5 : vector<1x256xf32> to vector<4x256xf32>
    %7 = arith.subf %1, %6 : vector<4x256xf32>
    %8 = arith.mulf %7, %7 : vector<4x256xf32>
    %cst_3 = arith.constant dense<0.000000e+00> : vector<256xf32>
    %9 = vector.multi_reduction <add>, %8, %cst_3 [0] : vector<4x256xf32> to vector<256xf32>
    %10 = vector.shape_cast %9 : vector<256xf32> to vector<1x256xf32>
    %cst_4 = arith.constant 4.000000e+00 : f32
    %11 = vector.broadcast %cst_4 : f32 to vector<1x256xf32>
    %12 = arith.divf %10, %11 : vector<1x256xf32>
    %13 = vector.broadcast %5 : vector<1x256xf32> to vector<4x256xf32>
    %14 = arith.subf %1, %13 : vector<4x256xf32>
    %cst_5 = arith.constant 9.99999974E-6 : f32
    %15 = vector.broadcast %cst_5 : f32 to vector<1x256xf32>
    %16 = arith.addf %12, %15 : vector<1x256xf32>
    %17 = math.rsqrt %16 : vector<1x256xf32>
    %18 = vector.broadcast %17 : vector<1x256xf32> to vector<4x256xf32>
    %19 = arith.mulf %14, %18 : vector<4x256xf32>
    %c0_6 = arith.constant 0 : index
    %c0_7 = arith.constant 0 : index
    %20 = vector.load %arg3[%c0_6, %c0_7] : memref<4x4xf32, #tpu.memory_space<vmem>>, vector<4x4xf32>
    %cst_8 = arith.constant dense<0.000000e+00> : vector<4x256xf32>
    %21 = tpu.matmul %20, %19, %cst_8 {dimension_numbers = #tpu.dot_dimension_numbers<[1], [0], [0], [1], [0, 0, 1, 1], [], []>} : vector<4x4xf32>, vector<4x256xf32>, vector<4x256xf32> -> vector<4x256xf32>
    %c0_9 = arith.constant 0 : index
    %c0_10 = arith.constant 0 : index
    %22 = vector.load %arg4[%c0_9, %c0_10] : memref<4x1xf32, #tpu.memory_space<vmem>>, vector<4x1xf32>
    %23 = vector.broadcast %22 : vector<4x1xf32> to vector<4x256xf32>
    %24 = arith.addf %21, %23 : vector<4x256xf32>
    %c0_11 = arith.constant 0 : index
    %c0_12 = arith.constant 0 : index
    %c0_13 = arith.constant 0 : index
    %25 = vector.load %arg5[%c0_11, %c0_12, %c0_13] : memref<1x4x256xf32, #tpu.memory_space<vmem>>, vector<1x4x256xf32>
    %26 = vector.shape_cast %25 : vector<1x4x256xf32> to vector<4x256xf32>
    %27 = vector.shape_cast %24 : vector<4x256xf32> to vector<1x4x256xf32>
    tpu.vector_store %arg5[%c0_11, %c0_12, %c0_13], %27 {strides = array<i32>} : memref<1x4x256xf32, #tpu.memory_space<vmem>>, vector<1x4x256xf32>,
    return
  }
  func.func @transform_0(%arg0: i32, %arg1: i32) -> (i32, i32, i32) {
    %c0_i32 = arith.constant 0 : i32
    %c0_i32_0 = arith.constant 0 : i32
    return %arg0, %c0_i32, %arg1 : i32, i32, i32
  }
  func.func @transform_1(%arg0: i32, %arg1: i32) -> (i32, i32) {
    %c0_i32 = arith.constant 0 : i32
    %c0_i32_0 = arith.constant 0 : i32
    %c0_i32_1 = arith.constant 0 : i32
    return %c0_i32, %c0_i32_0 : i32, i32
  }
  func.func @transform_2(%arg0: i32, %arg1: i32) -> (i32, i32) {
    %c0_i32 = arith.constant 0 : i32
    %c0_i32_0 = arith.constant 0 : i32
    %c0_i32_1 = arith.constant 0 : i32
    return %c0_i32, %c0_i32_0 : i32, i32
  }
  func.func @transform_3(%arg0: i32, %arg1: i32) -> (i32, i32, i32) {
    %c0_i32 = arith.constant 0 : i32
    %c0_i32_0 = arith.constant 0 : i32
    return %arg0, %c0_i32, %arg1 : i32, i32, i32
  }
}

</mosaic_0001>

<bundles_post_ra>
// kernel: tpu_custom_call.1
= control target key start
LH: loop header
LB: loop body
LE: loop exit
PB: predicated region body
PF: predicated region fallthrough
CT: control target
= control target key end

     0   :  { %8 = vsyncpa [#allocation3], 0  ;;  %s831_s0 = inlined_call_operand.hbm [shape: f32[2,4,256], index: 0, kind: input, shape index: {}]   ;;  %s832_s1 = inlined_call_operand.vmem [shape: f32[4,4], index: 1, kind: input, shape index: {}]   ;;  %s833_s2 = inlined_call_operand.vmem [shape: f32[4,1], index: 2, kind: input, shape index: {}]   ;;  %s834_s3 = inlined_call_operand.hbm [shape: f32[2,4,256], index: 3, kind: output, shape index: {}]  }
   0x1   :  { %10 = vsyncpa [#allocation3 + $0x1], 0 }
   0x2   :  { %11 = vsyncpa [#allocation4], 0 }
   0x3   :  { %13 = vsyncpa [#allocation4 + $0x1], 0  ;;  %s681_s12 = smov 0   ;;  %s683_s13 = smov 0  }
   0x4   :  { %s685_s14 = smov 0   ;;  %s687_s15 = smov 0  }
   0x5   :  { %s689_s16 = smov 0   ;;  %s691_s17 = smov 0  }
   0x6 LB: > { %s457_s18 = sadd.s32 4294967295, %s655_s17   ;;  %s458_s19 = sadd.s32 4294967294, %s655_s17   ;;  %s655_s17 = sphi %s691_s17, %s19_s17   ;;  %s651_s16 = sphi %s689_s16, %s846_s16   ;;  %s647_s15 = sphi %s687_s15, %s845_s15   ;;  %s643_s14 = sphi %s685_s14, %s844_s14   ;;  %s639_s13 = sphi %s683_s13, %s843_s13   ;;  %s635_s12 = sphi %s681_s12, %s842_s12  }
   0x7   : > { %s31_s20 = sadd.s32 1, %s651_s16  ;;  %s40_s21 = sadd.s32 1, %s643_s14 }
   0x8   : > { %p33_p0 = scmp.ge.s32.totalorder %s31_s20, 2  ;;  %p47_p1 = scmp.ne.s32.totalorder %s643_s14, %s639_s13 }
   0x9   : > { %p48_p2 = scmp.eq.s32.totalorder %s655_s17, 0  ;;  %p53_p3 = scmp.ne.s32.totalorder %s639_s13, %s635_s12 }
   0xa   : > { %s848_s20 = smov (%p33_p0, %s31_s20), 0  ;;  %p54_p5 = scmp.eq.s32.totalorder %s457_s18, 0 }
   0xb   : > { %p722_p4 = por %p48_p2, %p47_p1  ;;  %s35_s23 = ssub.s32 %s651_s16, %s848_s20 }
   0xc   : > { %p121_p6 = scmp.eq.s32.totalorder %s457_s18, 1  ;;  %p38_p7 = scmp.eq.s32.totalorder %s35_s23, 0 }
   0xd   : > { %p728_p8 = por %p54_p5, %p53_p3  ;;  %p127_p10 = scmp.eq.s32.totalorder %s458_s19, 1 }
   0xe   : > { %p732_p9 = por %p121_p6, %p47_p1  ;;  %p489_p13 = scmp.lt.s32.totalorder %s655_s17, 2 }
   0xf   : > { %s737_s26 = scalar_select %p38_p7, %s643_s14, %s40_s21  }
  0x10   : > { %p739_p11 = por %p127_p10, %p53_p3  ;;  %s153_s28 = sand.u32 1, %s643_s14  }
  0x11   : > { %s461_s29 = sshll.u32 %s153_s28, 3  ;;  %s475_s30 = sshll.u32 %s651_s16, 7 }
  0x12   : > { %s838_s27 = scalar_select %p739_p11, 1, 0 }
  0x13   : > { %s165_s6 = scalar_lea.hbm %s831_s0, %s475_s30  ;;  %s157_s7 = scalar_lea.vmem [#allocation2], %s461_s29 }
  0x14   : > { %s167_s8 = sshll.u32 %s157_s7, 4  ;;  %p752_p0 = pnand %p489_p13, %p722_p4  ;;  %s168_s8 = int_to_ptr.vmem [resolvable:$true] %s167_s8 }
  0x15   : > { %p464_p1 = scmp.ge.s32.totalorder %s655_s17, 1  ;;  %p172_p2 = scmp.lt.s32.totalorder %s655_s17, 3 }
  0x16   : > { %s154_s10 = scalar_lea.sflag [#allocation3], %s153_s28  ;;  %p549_p3 = pneg %p752_p0 }
  0x17   : > { %s560_s11 = scalar_lea.vmem %s168_s8, 128  ;;  %s657_s18 = smov [#allocation2]  }
  0x18   : > { %p561_p5 = scmp.ne.s32.totalorder %s168_s8, %s560_s11  ;;  %s565_s19 = sshll.u32 %s657_s18, 4  ;;  %s566_s19 = int_to_ptr.vmem [resolvable:$false] %s565_s19 }
  0x19   : > { %s567_s21 = scalar_lea.vmem %s566_s19, 256  ;;  %p568_p10 = scmp.lt.s32.totalorder %s168_s8, %s566_s19 }
  0x1a   : > { %p563_p6 = pnand %p561_p5, %p549_p3  ;;  %p569_p12 = scmp.lt.s32.totalorder %s567_s21, %s560_s11 }
  0x1c   : > { %p564_p7 = pneg %p563_p6  ;;  %p570_p4 = por %p569_p12, %p568_p10 }
  0x1e   : > { %p571_p13 = pnand %p570_p4, %p564_p7 }
  0x20   : > { %574 = shalt.err (!%p571_p13)
}
  0x21   : > { %484 = dma.hbm_to_vmem [thread:$0]  (!%p752_p0), %s165_s6, 128, %s168_s8, %s154_s10  }
  0x22   : > { %p173_p11 = pnand %p464_p1, %p172_p2 }
  0x23   : > { %s767_s22 = sand.u32 (!%p173_p11), 1, %s639_s13  }
  0x24   : > { %176 = sbr.rel (%p173_p11) target bundleno = 319 (0x13f), region = 32  ;;  %s465_s23 = sshll.u32 (!%p173_p11), %s767_s22, 3 }
  0x25   : > { %s179_s28 = scalar_lea.sflag (!%p173_p11), [#allocation3], %s767_s22  ;;  %s182_s29 = scalar_lea.vmem (!%p173_p11), [#allocation2], %s465_s23 }
  0x29   : > { %626 = dma.done.wait (%p728_p8), %s179_s28, 128  }
  0x2a   : > { %628 = vsyncadd (%p728_p8), %s179_s28, 4294967168  ;;  %v658_v0 = vmov 0.0   ;;  %v659_v1 = vmov 0   ;;  %vm211_vm0 = vcmask 1043456   ;;  %v207_v2 = vld [vmem:[%s182_s29] sm:$0xff]  ;;  %vm272_vm1 = vcmask 31744  }
  0x2b   : > { %344 = vmatprep.mubr.f32.mxu0 %v658_v0  ;;  %541 = vset.pattern.permute.xlu0 %v659_v1  ;;  %v264_v3 = vld [vmem:[%s833_s2] sm:$0xf]  ;;  %v209_v4 = vcombine.high %v207_v2, %v207_v2  ;;  %v212_v5 = vsel %vm211_vm0, %v207_v2, 0.0  ;;  %s476_s6 = sshll.u32 %s647_s15, 7  ;;  %s204_s7 = scalar_lea.vmem [#allocation5], %s465_s23 }
  0x2c   : > { %267 = vperm.xlu0 %541, %v264_v3   ;;  %v213_v6 = vrot.slane %v212_v5, 4  ;;  %v263_v48 = vld [vmem:[%s832_s1] sm:$0xf]  ;;  %s373_s8 = sshll.u32 %s204_s7, 4  ;;  %s371_s11 = scalar_lea.hbm %s834_s3, %s476_s6  ;;  %s374_s8 = int_to_ptr.vmem [resolvable:$true] %s373_s8 }
  0x2d   : > { %v219_v7 = vsel %vm211_vm0, %v209_v4, 0.0  ;;  %s357_s18 = scalar_lea.sflag [#allocation4], %s767_s22  ;;  %s575_s19 = scalar_lea.vmem %s374_s8, 128 }
  0x2e   : > { %v214_v8 = vadd.f32 %v213_v6, %v212_v5  ;;  %v220_v9 = vrot.slane %v219_v7, 4  ;;  %p576_p8 = scmp.ne.s32.totalorder %s374_s8, %s575_s19  ;;  %s660_s21 = smov [#allocation5]  }
  0x2f   : > { %s579_s15 = sshll.u32 %s660_s21, 4  ;;  %s580_s15 = int_to_ptr.vmem [resolvable:$false] %s579_s15 }
  0x30   : > { %v215_v10 = vrot.slane %v214_v8, 2  ;;  %v221_v11 = vadd.f32 %v220_v9, %v219_v7  ;;  %p577_p11 = pnand %p576_p8, %p732_p9  ;;  %s581_s23 = scalar_lea.vmem %s580_s15, 256 }
  0x31   : > { %p582_p0 = scmp.lt.s32.totalorder %s374_s8, %s580_s15  ;;  %p583_p1 = scmp.lt.s32.totalorder %s581_s23, %s575_s19 }
  0x32   : > { %v216_v12 = vadd.f32 %v215_v10, %v214_v8  ;;  %v222_v13 = vrot.slane %v221_v11, 2  ;;  %p578_p12 = pneg %p577_p11 }
  0x33   : > { %p584_p2 = por %p583_p1, %p582_p0 }
  0x34   : > { %v217_v14 = vrot.slane %v216_v12, 1  ;;  %v223_v15 = vadd.f32 %v222_v13, %v221_v11 }
  0x35   : > { %p585_p3 = pnand %p584_p2, %p578_p12 }
  0x36   : > { %v218_v16 = vadd.f32 %v217_v14, %v216_v12  ;;  %v224_v17 = vrot.slane %v223_v15, 1 }
  0x38   : > { %v225_v18 = vadd.f32 %v224_v17, %v223_v15  ;;  %v227_v19 = vmul.f32 0.25, %v218_v16 }
  0x3a   : > { %v228_v20 = vmul.f32 0.25, %v225_v18 }
  0x3c   : > { %v231_v21 = vcombine.low %v227_v19, %v228_v20 }
  0x3e   : > { %v233_v22 = vsub.f32 %v207_v2, %v231_v21 }
  0x40   : > { %v234_v23 = vmul.f32 %v233_v22, %v233_v22 }
  0x42   : > { %v236_v24 = vcombine.high %v234_v23, %v234_v23  ;;  %v238_v25 = vsel %vm211_vm0, %v234_v23, 0.0 }
  0x43   : > { %v239_v26 = vrot.slane %v238_v25, 4 }
  0x44   : > { %v245_v27 = vsel %vm211_vm0, %v236_v24, 0.0 }
  0x45   : > { %v240_v28 = vadd.f32 %v239_v26, %v238_v25  ;;  %v246_v29 = vrot.slane %v245_v27, 4 }
  0x47   : > { %v241_v30 = vrot.slane %v240_v28, 2  ;;  %v247_v31 = vadd.f32 %v246_v29, %v245_v27 }
  0x49   : > { %v242_v32 = vadd.f32 %v241_v30, %v240_v28  ;;  %v248_v33 = vrot.slane %v247_v31, 2 }
  0x4b   : > { %v243_v34 = vrot.slane %v242_v32, 1  ;;  %v249_v35 = vadd.f32 %v248_v33, %v247_v31 }
  0x4d   : > { %v244_v36 = vadd.f32 %v243_v34, %v242_v32  ;;  %v250_v37 = vrot.slane %v249_v35, 1 }
  0x4f   : > { %v251_v38 = vadd.f32 %v250_v37, %v249_v35  ;;  %v252_v39 = vmul.f32 0.25, %v244_v36 }
  0x51   : > { %v253_v40 = vmul.f32 0.25, %v251_v38  ;;  %v254_v41 = vadd.f32 1e-05, %v252_v39 }
  0x53   : > { %v255_v42 = vadd.f32 1e-05, %v253_v40  ;;  %543 = vrsqrt.f32 %v254_v41 }
  0x55   : > { %545 = vrsqrt.f32 %v255_v42 }
  0x60   : > { %v544_v43 = vpop.eup %543 }
  0x62   : > { %v546_v44 = vpop.eup %545 }
  0x63   : > { %v260_v45 = vcombine.low %v544_v43, %v546_v44 }
  0x65   : > { %v262_v46 = vmul.f32 %v260_v45, %v233_v22 }
  0x67   : > { %v271_v47 = vcombine.high %v262_v46, %v262_v46 }
  0x69   : > { %467 = vmatprep.subr.msk.mxu0 %vm211_vm0, %v271_v47 }
  0x6a   : > { %468 = vmatpush1.msk.msra.mxu0 %vm211_vm0, %v262_v46 }
  0x6b   : > { %469 = vmatmul.mubr.msk.f32.vlgmr.msra.gmra.mxu0 %vm272_vm1, %v263_v48 }
  0xa7   : > { %v268_v49 = vpop.permute.xlu0 %267 }
 0x12b   : > { %v346_v50 = vpop.f32.mrf.mxu0 }
 0x12c   : > { %v347_v52 = vadd.f32 %v346_v50, %v268_v49 }
 0x12d   : > { %v348_v51 = vpop.f32.mrf.mxu0 }
 0x12e   : > { %v349_v53 = vadd.f32 %v348_v51, %v268_v49 }
 0x130   : > { %v353_v54 = vcombine.low %v347_v52, %v349_v53 }
 0x132   : > { %355 = vst [vmem:[%s204_s7] sm:$0xff] %v353_v54 }
 0x133   : > { %588 = shalt.err (!%p585_p3)
}
 0x134   : > { %s589_s28 = scalar_lea.hbm %s371_s11, 128  ;;  %s593_s30 = scalar_lea.hbm %s834_s3, 256 }
 0x135   : > { %p590_p5 = scmp.ne.s32.totalorder %s371_s11, %s589_s28  ;;  %p594_p10 = scmp.lt.s32.totalorder %s371_s11, %s834_s3 }
 0x136   : > { %p595_p4 = scmp.lt.s32.totalorder %s593_s30, %s589_s28 }
 0x137   : > { %p591_p6 = pnand %p590_p5, %p732_p9 }
 0x138   : > { %p596_p13 = por %p595_p4, %p594_p10 }
 0x139   : > { %p592_p7 = pneg %p591_p6 }
 0x13b   : > { %p597_p8 = pnand %p596_p13, %p592_p7 }
 0x13d   : > { %600 = shalt.err (!%p597_p8)
}
 0x13e   : > { %479 = dma.vmem_to_hbm [thread:$0]  (%p732_p9), %s374_s8, 128, %s371_s11, %s357_s18  }
 0x13f PF: > { %s385_s5 = sand.u32 1, %s635_s12   ;;  %p840_p11 = scmp.ne.s32.totalorder %s838_s27, 0 }
 0x140   : > { %p841_p12 = scmp.ge.s32.totalorder %s655_s17, 2  ;;  %s386_s6 = scalar_lea.sflag [#allocation4], %s385_s5 }
 0x142   : > { %p486_p0 = pnand %p841_p12, %p840_p11 }
 0x144   : > { %p487_p1 = pneg %p486_p0 }
 0x146   : > { %630 = dma.done.wait (%p487_p1), %s386_s6, 128  }
 0x147   : > { %632 = vsyncadd (%p487_p1), %s386_s6, 4294967168  ;;  %s19_s17 = sadd.s32 1, %s655_s17   ;;  %s842_s12 = smov %s639_s13 }
 0x148   : > { %p16_p2 = scmp.ge.s32.totalorder %s19_s17, 4   ;;  %s843_s13 = smov %s643_s14 }
 0x149   : > { %s844_s14 = smov %s737_s26  ;;  %s845_s15 = smov %s651_s16 }
 0x14a   : > { %s846_s16 = smov %s848_s20  ;;  %18 = sbr.rel (!%p16_p2) target bundleno = 6 (0x6), region = 77 }
 0x14f   :  { %391 = vsyncpa [#allocation3], 1 }
 0x150   :  { %393 = vsyncpa [#allocation3 + $0x1], 1 }
 0x151   :  { %394 = vsyncpa [#allocation4], 1 }
 0x152   :  { %396 = vsyncpa [#allocation4 + $0x1], 1 }

</bundles_post_ra>
